<compile_context>
chip_gen: v6e
topology: v6e:2x2x1
jax: 0.10.0
libtpu: 0.0.40
codegen_flags: <defaults>
</compile_context>

<pallas_src>
import math

import jax
import jax.numpy as jnp
from jax.experimental import pallas as pl
from jax.experimental.pallas import tpu as pltpu


def _mha_kernel(q_ref, kv_ref, wq_ref, wkv_ref, wo_ref, bo_ref, out_ref):
    """Fused multi-head attention.

    q_ref:   (N, Lq, E)     bf16  raw query (lane-dense E).
    kv_ref:  (2, N, Lk, E)  bf16  stacked [keys, values].
    wq_ref:  (H, E, D)      bf16  per-head block-row query weight, 1/sqrt(E) folded.
    wkv_ref: (2, H, E, D)   bf16  stacked per-head block-row [key, value] weights.
    wo_ref:  (H, D, E)      bf16  fc_out weight.T viewed per head.
    bo_ref:  (1, 1, E)      f32   fc_out bias.
    out_ref: (N, Lq, E)     f32.
    """
    f32, bf16 = jnp.float32, jnp.bfloat16
    N, Lq, E = out_ref.shape
    H, _, D = wq_ref.shape
    Lk = kv_ref.shape[2]
    B = N * H  # joint (batch, head) dim for all batched contractions

    # ---- q/k/v projections: K = E per MXU push, head split via weight batch --
    q_in = jnp.broadcast_to(q_ref[...][:, None], (N, H, Lq, E)).reshape(B, Lq, E)
    wq_b = jnp.broadcast_to(wq_ref[...][None], (N, H, E, D)).reshape(B, E, D)
    q = jnp.einsum('bqe,bed->bqd', q_in, wq_b,
                   preferred_element_type=f32).astype(bf16)           # (B, Lq, D)

    kv_in = jnp.broadcast_to(kv_ref[...][:, :, None],
                             (2, N, H, Lk, E)).reshape(2 * B, Lk, E)
    wkv_b = jnp.broadcast_to(wkv_ref[...][:, None],
                             (2, N, H, E, D)).reshape(2 * B, E, D)
    kv = jnp.einsum('bke,bed->bkd', kv_in, wkv_b,
                    preferred_element_type=f32).astype(bf16)          # (2B, Lk, D)
    kv = kv.reshape(2, B, Lk, D)
    k, v = kv[0], kv[1]

    # ---- attention over all (n, h) pairs; softmax in f32 ---------------------
    energy = jnp.einsum('bqd,bkd->bqk', q, k,
                        preferred_element_type=f32)                   # (B, Lq, Lk)
    m = jnp.max(energy, axis=-1, keepdims=True)
    p = jnp.exp(energy - m)
    attn = p * pl.reciprocal(jnp.sum(p, axis=-1, keepdims=True), approx=True)
    ctx = jnp.einsum('bqk,bkd->bqd', attn.astype(bf16), v,
                     preferred_element_type=f32).astype(bf16)         # (B, Lq, D)

    # ---- head-concat + fc_out -------------------------------------------------
    # wo lives once in VMEM as (H, D, E); the N-way replication below is a cheap
    # in-register broadcast (no HBM/DMA duplication like the old (N*H, D, E)).
    wo_b = jnp.broadcast_to(wo_ref[...][None], (N, H, D, E)).reshape(B, D, E)
    part = jnp.einsum('bqd,bde->bqe', ctx, wo_b,
                      preferred_element_type=f32)                     # (B, Lq, E)
    out = jnp.sum(part.reshape(N, H, Lq, E), axis=1) + bo_ref[...]    # (N, Lq, E)
    out_ref[...] = out


def _per_head_proj_weight(w, heads, scale=1.0):
    """torch Linear weight (D, D) -> (H, E, D) bf16 block-row weights.

    For a lane-dense input x2 of shape (M, E) with E = H*D laid out head-major,
    x2 @ out[h] == x2[:, h*D:(h+1)*D] @ (w.T * scale).
    """
    D = w.shape[0]
    heads_eye = jnp.eye(heads, dtype=w.dtype)
    block = jnp.kron(heads_eye, w.T * scale)                    # (E, E) block-diag
    E = heads * D
    return block.reshape(E, heads, D).transpose(1, 0, 2).astype(jnp.bfloat16)


def multi_head_attention(values, keys, query, params, heads):
    """Pallas forward pass equivalent to MultiHeadAttention.forward."""
    N, Lv, E = values.shape
    Lk = keys.shape[1]
    Lq = query.shape[1]
    H = heads
    D = E // H
    assert D * H == E, 'Embedding size needs to be divisible by heads'
    assert Lk == Lv  # keys and values share the sequence axis

    bf16 = jnp.bfloat16
    scale = 1.0 / math.sqrt(E)          # reference divides energy by sqrt(embed_size)

    q_in = query.astype(bf16)                              # (N, Lq, E)
    kv_in = jnp.stack([keys, values]).astype(bf16)         # (2, N, Lk, E)

    wq_h = _per_head_proj_weight(params['wq'], H, scale)   # (H, E, D), scale folded
    wkv_h = jnp.stack([_per_head_proj_weight(params['wk'], H),
                       _per_head_proj_weight(params['wv'], H)])  # (2, H, E, D)
    wo_h = params['wo'].T.reshape(H, D, E).astype(bf16)    # (H, D, E)
    bo = params['bo'].reshape(1, 1, E).astype(jnp.float32)

    vmem = pl.BlockSpec(memory_space=pltpu.MemorySpace.VMEM)
    return pl.pallas_call(
        _mha_kernel,
        out_shape=jax.ShapeDtypeStruct((N, Lq, E), jnp.float32),
        in_specs=[vmem] * 6,
        out_specs=vmem,
    )(q_in, kv_in, wq_h, wkv_h, wo_h, bo)


def init_params(key, embed_size, heads):
    """Parameters matching the torch module (torch Linear default init)."""
    D = embed_size // heads

    def linear_w(k, fan_in, fan_out):
        bound = 1.0 / math.sqrt(fan_in)
        return jax.random.uniform(k, (fan_out, fan_in), jnp.float32, -bound, bound)

    k1, k2, k3, k4, k5 = jax.random.split(key, 5)
    bound = 1.0 / math.sqrt(embed_size)
    return {
        'wv': linear_w(k1, D, D),                    # values: Linear(D, D, bias=False)
        'wk': linear_w(k2, D, D),                    # keys
        'wq': linear_w(k3, D, D),                    # queries
        'wo': linear_w(k4, embed_size, embed_size),  # fc_out: Linear(E, E)
        'bo': jax.random.uniform(k5, (embed_size,), jnp.float32, -bound, bound),
    }


def mha_reference(values, keys, query, p, heads):
    """Pure-JAX f32 mirror of the torch forward() for verification."""
    N, Lv, E = values.shape
    Lk, Lq = keys.shape[1], query.shape[1]
    D = E // heads
    v = values.reshape(N, Lv, heads, D) @ p['wv'].T
    k = keys.reshape(N, Lk, heads, D) @ p['wk'].T
    q = query.reshape(N, Lq, heads, D) @ p['wq'].T
    energy = jnp.einsum('nqhd,nkhd->nhqk', q, k)
    attn = jax.nn.softmax(energy / math.sqrt(E), axis=3)
    out = jnp.einsum('nhql,nlhd->nqhd', attn, v).reshape(N, Lq, heads * D)
    return out @ p['wo'].T + p['bo']


if __name__ == '__main__':
    N, L, E, H = 2, 8, 64, 4    # batch=2, seq=8, embed=64, heads=4 (head_dim=16)
    key = jax.random.PRNGKey(0)
    kv_key, kk_key, kq_key, kp_key = jax.random.split(key, 4)
    values = jax.random.normal(kv_key, (N, L, E), jnp.float32)
    keys_in = jax.random.normal(kk_key, (N, L, E), jnp.float32)
    query = jax.random.normal(kq_key, (N, L, E), jnp.float32)
    params = init_params(kp_key, E, H)

    out = multi_head_attention(values, keys_in, query, params, H)
    jax.block_until_ready(out)

    assert out.shape == (N, L, E) and out.dtype == jnp.float32
    ref = mha_reference(values, keys_in, query, params, H)
    max_err = float(jnp.max(jnp.abs(out - ref)))
    assert max_err < 5e-2, f'max abs error {max_err}'   # bf16 matmul tolerance
    print("KERNEL_OK")
</pallas_src>

<mosaic_0001>
module attributes {stable_mosaic.version = 11 : i64} {
  func.func @_mha_kernel(%arg0: memref<2x8x64xbf16, #tpu.memory_space<vmem>>, %arg1: memref<2x2x8x64xbf16, #tpu.memory_space<vmem>>, %arg2: memref<4x64x16xbf16, #tpu.memory_space<vmem>>, %arg3: memref<2x4x64x16xbf16, #tpu.memory_space<vmem>>, %arg4: memref<4x16x64xbf16, #tpu.memory_space<vmem>>, %arg5: memref<1x1x64xf32, #tpu.memory_space<vmem>>, %arg6: memref<2x8x64xf32, #tpu.memory_space<vmem>>) attributes {dimension_semantics = [], scalar_prefetch = 0 : i64, scratch_operands = 0 : i64, tpu.core_type = #tpu.core_type<tc>} {
    %c0 = arith.constant 0 : index
    %c0_0 = arith.constant 0 : index
    %c0_1 = arith.constant 0 : index
    %0 = vector.load %arg0[%c0, %c0_0, %c0_1] : memref<2x8x64xbf16, #tpu.memory_space<vmem>>, vector<2x8x64xbf16>
    %1 = vector.shape_cast %0 : vector<2x8x64xbf16> to vector<2x1x8x64xbf16>
    %2 = vector.shape_cast %1 : vector<2x1x8x64xbf16> to vector<2x1x8x64xbf16>
    %3 = vector.broadcast %2 : vector<2x1x8x64xbf16> to vector<2x4x8x64xbf16>
    %4 = vector.shape_cast %3 : vector<2x4x8x64xbf16> to vector<8x8x64xbf16>
    %c0_2 = arith.constant 0 : index
    %c0_3 = arith.constant 0 : index
    %c0_4 = arith.constant 0 : index
    %5 = vector.load %arg2[%c0_2, %c0_3, %c0_4] : memref<4x64x16xbf16, #tpu.memory_space<vmem>>, vector<4x64x16xbf16>
    %6 = vector.shape_cast %5 : vector<4x64x16xbf16> to vector<1x4x64x16xbf16>
    %7 = vector.shape_cast %6 : vector<1x4x64x16xbf16> to vector<1x4x64x16xbf16>
    %8 = vector.broadcast %7 : vector<1x4x64x16xbf16> to vector<2x4x64x16xbf16>
    %9 = vector.shape_cast %8 : vector<2x4x64x16xbf16> to vector<8x64x16xbf16>
    "tpu.trace_start"() <{level = 10 : i32, message = "bqe,bed->bqd"}> : () -> ()
    %cst = arith.constant dense<0.000000e+00> : vector<8x8x16xf32>
    %10 = tpu.matmul %4, %9, %cst {dimension_numbers = #tpu.dot_dimension_numbers<[2], [1], [1], [2], [0, 0, 0, 1, 1, 2], [0], [0]>} : vector<8x8x64xbf16>, vector<8x64x16xbf16>, vector<8x8x16xf32> -> vector<8x8x16xf32>
    "tpu.trace_stop"() : () -> ()
    %11 = arith.truncf %10 : vector<8x8x16xf32> to vector<8x8x16xbf16>
    %c0_5 = arith.constant 0 : index
    %c0_6 = arith.constant 0 : index
    %c0_7 = arith.constant 0 : index
    %c0_8 = arith.constant 0 : index
    %12 = vector.load %arg1[%c0_5, %c0_6, %c0_7, %c0_8] : memref<2x2x8x64xbf16, #tpu.memory_space<vmem>>, vector<2x2x8x64xbf16>
    %13 = vector.shape_cast %12 : vector<2x2x8x64xbf16> to vector<2x2x1x8x64xbf16>
    %14 = vector.shape_cast %13 : vector<2x2x1x8x64xbf16> to vector<2x2x1x8x64xbf16>
    %15 = vector.broadcast %14 : vector<2x2x1x8x64xbf16> to vector<2x2x4x8x64xbf16>
    %16 = vector.shape_cast %15 : vector<2x2x4x8x64xbf16> to vector<16x8x64xbf16>
    %c0_9 = arith.constant 0 : index
    %c0_10 = arith.constant 0 : index
    %c0_11 = arith.constant 0 : index
    %c0_12 = arith.constant 0 : index
    %17 = vector.load %arg3[%c0_9, %c0_10, %c0_11, %c0_12] : memref<2x4x64x16xbf16, #tpu.memory_space<vmem>>, vector<2x4x64x16xbf16>
    %18 = vector.shape_cast %17 : vector<2x4x64x16xbf16> to vector<2x1x4x64x16xbf16>
    %19 = vector.shape_cast %18 : vector<2x1x4x64x16xbf16> to vector<2x1x4x64x16xbf16>
    %20 = vector.broadcast %19 : vector<2x1x4x64x16xbf16> to vector<2x2x4x64x16xbf16>
    %21 = vector.shape_cast %20 : vector<2x2x4x64x16xbf16> to vector<16x64x16xbf16>
    "tpu.trace_start"() <{level = 10 : i32, message = "bke,bed->bkd"}> : () -> ()
    %cst_13 = arith.constant dense<0.000000e+00> : vector<16x8x16xf32>
    %22 = tpu.matmul %16, %21, %cst_13 {dimension_numbers = #tpu.dot_dimension_numbers<[2], [1], [1], [2], [0, 0, 0, 1, 1, 2], [0], [0]>} : vector<16x8x64xbf16>, vector<16x64x16xbf16>, vector<16x8x16xf32> -> vector<16x8x16xf32>
    "tpu.trace_stop"() : () -> ()
    %23 = arith.truncf %22 : vector<16x8x16xf32> to vector<16x8x16xbf16>
    %24 = vector.shape_cast %23 : vector<16x8x16xbf16> to vector<2x8x8x16xbf16>
    %25 = vector.extract_strided_slice %24 {offsets = [0, 0, 0, 0], sizes = [1, 8, 8, 16], strides = [1, 1, 1, 1]} : vector<2x8x8x16xbf16> to vector<1x8x8x16xbf16>
    %26 = vector.shape_cast %25 : vector<1x8x8x16xbf16> to vector<8x8x16xbf16>
    %27 = vector.extract_strided_slice %24 {offsets = [1, 0, 0, 0], sizes = [1, 8, 8, 16], strides = [1, 1, 1, 1]} : vector<2x8x8x16xbf16> to vector<1x8x8x16xbf16>
    %28 = vector.shape_cast %27 : vector<1x8x8x16xbf16> to vector<8x8x16xbf16>
    "tpu.trace_start"() <{level = 10 : i32, message = "bqd,bkd->bqk"}> : () -> ()
    %cst_14 = arith.constant dense<0.000000e+00> : vector<8x8x8xf32>
    %29 = tpu.matmul %11, %26, %cst_14 {dimension_numbers = #tpu.dot_dimension_numbers<[2], [2], [1], [1], [0, 0, 0, 1, 1, 1], [0], [0]>} : vector<8x8x16xbf16>, vector<8x8x16xbf16>, vector<8x8x8xf32> -> vector<8x8x8xf32>
    "tpu.trace_stop"() : () -> ()
    %cst_15 = arith.constant dense<0xFF800000> : vector<8x8xf32>
    %30 = vector.multi_reduction <maximumf>, %29, %cst_15 [2] : vector<8x8x8xf32> to vector<8x8xf32>
    %31 = vector.shape_cast %30 : vector<8x8xf32> to vector<8x8x1xf32>
    %32 = vector.broadcast %31 : vector<8x8x1xf32> to vector<8x8x8xf32>
    %33 = arith.subf %29, %32 : vector<8x8x8xf32>
    %34 = math.exp %33 : vector<8x8x8xf32>
    %cst_16 = arith.constant dense<0.000000e+00> : vector<8x8xf32>
    %35 = vector.multi_reduction <add>, %34, %cst_16 [2] : vector<8x8x8xf32> to vector<8x8xf32>
    %36 = vector.shape_cast %35 : vector<8x8xf32> to vector<8x8x1xf32>
    %37 = tpu.reciprocal %36 {approx = true} : vector<8x8x1xf32> -> vector<8x8x1xf32>
    %38 = vector.broadcast %37 : vector<8x8x1xf32> to vector<8x8x8xf32>
    %39 = arith.mulf %34, %38 : vector<8x8x8xf32>
    %40 = arith.truncf %39 : vector<8x8x8xf32> to vector<8x8x8xbf16>
    "tpu.trace_start"() <{level = 10 : i32, message = "bqk,bkd->bqd"}> : () -> ()
    %cst_17 = arith.constant dense<0.000000e+00> : vector<8x8x16xf32>
    %41 = tpu.matmul %40, %28, %cst_17 {dimension_numbers = #tpu.dot_dimension_numbers<[2], [1], [1], [2], [0, 0, 0, 1, 1, 2], [0], [0]>} : vector<8x8x8xbf16>, vector<8x8x16xbf16>, vector<8x8x16xf32> -> vector<8x8x16xf32>
    "tpu.trace_stop"() : () -> ()
    %42 = arith.truncf %41 : vector<8x8x16xf32> to vector<8x8x16xbf16>
    %c0_18 = arith.constant 0 : index
    %c0_19 = arith.constant 0 : index
    %c0_20 = arith.constant 0 : index
    %43 = vector.load %arg4[%c0_18, %c0_19, %c0_20] : memref<4x16x64xbf16, #tpu.memory_space<vmem>>, vector<4x16x64xbf16>
    %44 = vector.shape_cast %43 : vector<4x16x64xbf16> to vector<1x4x16x64xbf16>
    %45 = vector.shape_cast %44 : vector<1x4x16x64xbf16> to vector<1x4x16x64xbf16>
    %46 = vector.broadcast %45 : vector<1x4x16x64xbf16> to vector<2x4x16x64xbf16>
    %47 = vector.shape_cast %46 : vector<2x4x16x64xbf16> to vector<8x16x64xbf16>
    "tpu.trace_start"() <{level = 10 : i32, message = "bqd,bde->bqe"}> : () -> ()
    %cst_21 = arith.constant dense<0.000000e+00> : vector<8x8x64xf32>
    %48 = tpu.matmul %42, %47, %cst_21 {dimension_numbers = #tpu.dot_dimension_numbers<[2], [1], [1], [2], [0, 0, 0, 1, 1, 2], [0], [0]>} : vector<8x8x16xbf16>, vector<8x16x64xbf16>, vector<8x8x64xf32> -> vector<8x8x64xf32>
    "tpu.trace_stop"() : () -> ()
    %49 = vector.shape_cast %48 : vector<8x8x64xf32> to vector<2x4x8x64xf32>
    %cst_22 = arith.constant dense<0.000000e+00> : vector<2x8x64xf32>
    %50 = vector.multi_reduction <add>, %49, %cst_22 [1] : vector<2x4x8x64xf32> to vector<2x8x64xf32>
    %c0_23 = arith.constant 0 : index
    %c0_24 = arith.constant 0 : index
    %c0_25 = arith.constant 0 : index
    %51 = vector.load %arg5[%c0_23, %c0_24, %c0_25] : memref<1x1x64xf32, #tpu.memory_space<vmem>>, vector<1x1x64xf32>
    %52 = vector.broadcast %51 : vector<1x1x64xf32> to vector<2x8x64xf32>
    %53 = arith.addf %50, %52 : vector<2x8x64xf32>
    %c0_26 = arith.constant 0 : index
    %c0_27 = arith.constant 0 : index
    %c0_28 = arith.constant 0 : index
    %54 = vector.load %arg6[%c0_26, %c0_27, %c0_28] : memref<2x8x64xf32, #tpu.memory_space<vmem>>, vector<2x8x64xf32>
    tpu.vector_store %arg6[%c0_26, %c0_27, %c0_28], %53 {strides = array<i32>} : memref<2x8x64xf32, #tpu.memory_space<vmem>>, vector<2x8x64xf32>,
    return
  }
}

</mosaic_0001>

<bundles_post_ra>
// kernel: tpu_custom_call.1
= control target key start
LH: loop header
LB: loop body
LE: loop exit
PB: predicated region body
PF: predicated region fallthrough
CT: control target
= control target key end

     0   :  { %v3490_v1 = vmov 0.0   ;;  %vm3491_vm0 = vmmov 0   ;;  %vm83_vm1 = vcmask 523264   ;;  %s4066_s0 = inlined_call_operand.vmem [shape: bf16[2,8,64], index: 0, kind: input, shape index: {}]   ;;  %s4067_s1 = inlined_call_operand.vmem [shape: bf16[2,2,8,64], index: 1, kind: input, shape index: {}]   ;;  %s4068_s2 = inlined_call_operand.vmem [shape: bf16[4,64,16], index: 2, kind: input, shape index: {}]   ;;  %s4069_s3 = inlined_call_operand.vmem [shape: bf16[2,4,64,16], index: 3, kind: input, shape index: {}]   ;;  %s4070_s4 = inlined_call_operand.vmem [shape: bf16[4,16,64], index: 4, kind: input, shape index: {}]   ;;  %s4071_s5 = inlined_call_operand.vmem [shape: f32[1,1,64], index: 5, kind: input, shape index: {}]   ;;  %s4072_s6 = inlined_call_operand.hbm [shape: f32[2,8,64], index: 6, kind: output, shape index: {}]  }
   0x1   :  { %v3384_v0 = vld [vmem:[%s4068_s2 + $0x18] sm:$0xff]   ;;  %2947 = vmatprep.subr.bf16.mxu0 %v3490_v1  ;;  %2959 = vmatprep.subr.bf16.mxu1 %v3490_v1  ;;  %v3386_v3 = vld [vmem:[%s4068_s2 + $0x10] sm:$0xff]   ;;  %v3388_v5 = vld [vmem:[%s4068_s2 + $0x8] sm:$0xff]  }
   0x2   :  { %v3385_v2 = vld [vmem:[%s4068_s2 + $0x38] sm:$0xff]   ;;  %2948 = vmatpush3.bf16.msra.mxu0 %v3384_v0  ;;  %2955 = vmatprep.mubr.msk.bf16.mxu0 %vm3491_vm0, %v3490_v1  ;;  %v3387_v4 = vld [vmem:[%s4068_s2 + $0x30] sm:$0xff]   ;;  %v3389_v6 = vld [vmem:[%s4068_s2 + $0x28] sm:$0xff]  }
   0x3   :  { %2960 = vmatpush3.bf16.msra.mxu1 %v3385_v2  ;;  %2949 = vmatprep.subr.bf16.mxu0 %v3490_v1  ;;  %v3390_v7 = vld [vmem:[%s4068_s2] sm:$0xff]   ;;  %v3392_v10 = vld [vmem:[%s4068_s2 + $0x58] sm:$0xff]   ;;  %v3394_v12 = vld [vmem:[%s4068_s2 + $0x50] sm:$0xff]  }
   0x4   :  { %2961 = vmatprep.subr.bf16.mxu1 %v3490_v1  ;;  %2967 = vmatprep.mubr.msk.bf16.mxu1 %vm3491_vm0, %v3490_v1  ;;  %v3391_v8 = vld [vmem:[%s4068_s2 + $0x20] sm:$0xff]   ;;  %v3393_v11 = vld [vmem:[%s4068_s2 + $0x78] sm:$0xff]   ;;  %v3395_v13 = vld [vmem:[%s4068_s2 + $0x70] sm:$0xff]  }
   0x5   :  { %v25_v9 = vld [vmem:[%s4066_s0] sm:$0xf]  ;;  %v3396_v14 = vld [vmem:[%s4068_s2 + $0x48] sm:$0xff]   ;;  %v26_v18 = vld [vmem:[%s4066_s0 + $0x4] sm:$0xf] }
   0x6   :  { %2950 = vmatpush3.bf16.msra.mxu0 %v3386_v3  ;;  %v3397_v15 = vld [vmem:[%s4068_s2 + $0x68] sm:$0xff]   ;;  %v3398_v16 = vld [vmem:[%s4068_s2 + $0x40] sm:$0xff]  }
   0x7   :  { %2962 = vmatpush3.bf16.msra.mxu1 %v3387_v4  ;;  %2951 = vmatprep.subr.bf16.mxu0 %v3490_v1  ;;  %v3399_v17 = vld [vmem:[%s4068_s2 + $0x60] sm:$0xff]  }
   0x8   :  { %2963 = vmatprep.subr.bf16.mxu1 %v3490_v1 }
   0xa   :  { %2952 = vmatpush3.bf16.msra.mxu0 %v3388_v5 }
   0xb   :  { %2964 = vmatpush3.bf16.msra.mxu1 %v3389_v6  ;;  %2953 = vmatprep.subr.bf16.mxu0 %v3490_v1 }
   0xc   :  { %2965 = vmatprep.subr.bf16.mxu1 %v3490_v1 }
   0xe   :  { %2954 = vmatpush3.bf16.msra.mxu0 %v3390_v7 }
   0xf   :  { %2966 = vmatpush3.bf16.msra.mxu1 %v3391_v8  ;;  %2971 = vmatprep.subr.bf16.mxu0 %v3490_v1 }
  0x10   :  { %2983 = vmatprep.subr.bf16.mxu1 %v3490_v1 }
  0x11   :  { %2956 = vmatmul.mubr.msk.bf16.vlgmr.msra.gmra.mxu0 %vm83_vm1, %v25_v9 }
  0x12   :  { %2968 = vmatmul.mubr.msk.bf16.vlgmr.msra.gmra.mxu1 %vm83_vm1, %v25_v9  ;;  %2972 = vmatpush3.bf16.msra.mxu0 %v3392_v10 }
  0x13   :  { %2984 = vmatpush3.bf16.msra.mxu1 %v3393_v11  ;;  %2973 = vmatprep.subr.bf16.mxu0 %v3490_v1 }
  0x14   :  { %2985 = vmatprep.subr.bf16.mxu1 %v3490_v1  ;;  %2979 = vmatprep.mubr.msk.bf16.mxu0 %vm3491_vm0, %v3490_v1 }
  0x15   :  { %2991 = vmatprep.mubr.msk.bf16.mxu1 %vm3491_vm0, %v3490_v1 }
  0x16   :  { %2974 = vmatpush3.bf16.msra.mxu0 %v3394_v12 }
  0x17   :  { %2986 = vmatpush3.bf16.msra.mxu1 %v3395_v13  ;;  %2975 = vmatprep.subr.bf16.mxu0 %v3490_v1 }
  0x18   :  { %2987 = vmatprep.subr.bf16.mxu1 %v3490_v1 }
  0x1a   :  { %2976 = vmatpush3.bf16.msra.mxu0 %v3396_v14 }
  0x1b   :  { %2988 = vmatpush3.bf16.msra.mxu1 %v3397_v15  ;;  %2977 = vmatprep.subr.bf16.mxu0 %v3490_v1 }
  0x1c   :  { %2989 = vmatprep.subr.bf16.mxu1 %v3490_v1 }
  0x1e   :  { %2978 = vmatpush3.bf16.msra.mxu0 %v3398_v16 }
  0x1f   :  { %2990 = vmatpush3.bf16.msra.mxu1 %v3399_v17  ;;  %2995 = vmatprep.subr.bf16.mxu0 %v3490_v1 }
  0x20   :  { %3007 = vmatprep.subr.bf16.mxu1 %v3490_v1 }
  0x21   :  { %2980 = vmatmul.mubr.msk.bf16.vlgmr.msra.gmra.mxu0 %vm83_vm1, %v25_v9 }
  0x22   :  { %2992 = vmatmul.mubr.msk.bf16.vlgmr.msra.gmra.mxu1 %vm83_vm1, %v25_v9  ;;  %2996 = vmatpush3.bf16.msra.mxu0 %v3384_v0 }
  0x23   :  { %3008 = vmatpush3.bf16.msra.mxu1 %v3385_v2  ;;  %2997 = vmatprep.subr.bf16.mxu0 %v3490_v1 }
  0x24   :  { %3009 = vmatprep.subr.bf16.mxu1 %v3490_v1  ;;  %3003 = vmatprep.mubr.msk.bf16.mxu0 %vm3491_vm0, %v3490_v1 }
  0x25   :  { %3015 = vmatprep.mubr.msk.bf16.mxu1 %vm3491_vm0, %v3490_v1 }
  0x26   :  { %2998 = vmatpush3.bf16.msra.mxu0 %v3386_v3 }
  0x27   :  { %3010 = vmatpush3.bf16.msra.mxu1 %v3387_v4  ;;  %2999 = vmatprep.subr.bf16.mxu0 %v3490_v1 }
  0x28   :  { %3011 = vmatprep.subr.bf16.mxu1 %v3490_v1 }
  0x2a   :  { %3000 = vmatpush3.bf16.msra.mxu0 %v3388_v5 }
  0x2b   :  { %3012 = vmatpush3.bf16.msra.mxu1 %v3389_v6  ;;  %3001 = vmatprep.subr.bf16.mxu0 %v3490_v1 }
  0x2c   :  { %3013 = vmatprep.subr.bf16.mxu1 %v3490_v1 }
  0x2e   :  { %3002 = vmatpush3.bf16.msra.mxu0 %v3390_v7 }
  0x2f   :  { %11 = vsyncpa [#allocation3], 0  ;;  %3014 = vmatpush3.bf16.msra.mxu1 %v3391_v8  ;;  %3019 = vmatprep.subr.bf16.mxu0 %v3490_v1  ;;  %v3400_v19 = vld [vmem:[%s4069_s3 + $0x18] sm:$0xff]   ;;  %v3402_v21 = vld [vmem:[%s4069_s3 + $0x10] sm:$0xff]   ;;  %vm1418_vm2 = vcmask 130048   ;;  %vm1887_vm3 = vcmask 1043456  }
  0x30   :  { %3031 = vmatprep.subr.bf16.mxu1 %v3490_v1  ;;  %v3401_v20 = vld [vmem:[%s4069_s3 + $0x38] sm:$0xff]   ;;  %v3403_v22 = vld [vmem:[%s4069_s3 + $0x30] sm:$0xff]   ;;  %v3404_v23 = vld [vmem:[%s4069_s3 + $0x8] sm:$0xff]   ;;  %vm1787_vm4 = vcmask 64512  }
  0x31   :  { %3004 = vmatmul.mubr.msk.bf16.vlgmr.msra.gmra.mxu0 %vm83_vm1, %v26_v18  ;;  %v3405_v24 = vld [vmem:[%s4069_s3 + $0x28] sm:$0xff]   ;;  %v3406_v25 = vld [vmem:[%s4069_s3] sm:$0xff]   ;;  %v3408_v28 = vld [vmem:[%s4069_s3 + $0x58] sm:$0xff]  }
  0x32   :  { %3016 = vmatmul.mubr.msk.bf16.vlgmr.msra.gmra.mxu1 %vm83_vm1, %v26_v18  ;;  %3020 = vmatpush3.bf16.msra.mxu0 %v3392_v10  ;;  %v3407_v26 = vld [vmem:[%s4069_s3 + $0x20] sm:$0xff]   ;;  %v3409_v29 = vld [vmem:[%s4069_s3 + $0x78] sm:$0xff]   ;;  %v3410_v30 = vld [vmem:[%s4069_s3 + $0x50] sm:$0xff]  }
  0x33   :  { %3032 = vmatpush3.bf16.msra.mxu1 %v3393_v11  ;;  %3021 = vmatprep.subr.bf16.mxu0 %v3490_v1  ;;  %v490_v27 = vld [vmem:[%s4067_s1] sm:$0xf]  ;;  %v3411_v31 = vld [vmem:[%s4069_s3 + $0x70] sm:$0xff]   ;;  %v3412_v32 = vld [vmem:[%s4069_s3 + $0x48] sm:$0xff]  }
  0x34   :  { %3033 = vmatprep.subr.bf16.mxu1 %v3490_v1  ;;  %3027 = vmatprep.mubr.msk.bf16.mxu0 %vm3491_vm0, %v3490_v1  ;;  %v3413_v33 = vld [vmem:[%s4069_s3 + $0x68] sm:$0xff]   ;;  %v3414_v34 = vld [vmem:[%s4069_s3 + $0x40] sm:$0xff]   ;;  %v3416_v37 = vld [vmem:[%s4069_s3 + $0x98] sm:$0xff]  }
  0x35   :  { %3039 = vmatprep.mubr.msk.bf16.mxu1 %vm3491_vm0, %v3490_v1  ;;  %v3415_v35 = vld [vmem:[%s4069_s3 + $0x60] sm:$0xff]   ;;  %v3417_v38 = vld [vmem:[%s4069_s3 + $0xb8] sm:$0xff]   ;;  %v3418_v39 = vld [vmem:[%s4069_s3 + $0x90] sm:$0xff]  }
  0x36   :  { %3022 = vmatpush3.bf16.msra.mxu0 %v3394_v12  ;;  %v491_v36 = vld [vmem:[%s4067_s1 + $0x4] sm:$0xf]  ;;  %v3419_v40 = vld [vmem:[%s4069_s3 + $0xb0] sm:$0xff]   ;;  %v3420_v41 = vld [vmem:[%s4069_s3 + $0x88] sm:$0xff]  }
  0x37   :  { %3034 = vmatpush3.bf16.msra.mxu1 %v3395_v13  ;;  %3023 = vmatprep.subr.bf16.mxu0 %v3490_v1  ;;  %v3421_v42 = vld [vmem:[%s4069_s3 + $0xa8] sm:$0xff]   ;;  %v3422_v43 = vld [vmem:[%s4069_s3 + $0x80] sm:$0xff]   ;;  %v3424_v46 = vld [vmem:[%s4069_s3 + $0xd8] sm:$0xff]  }
  0x38   :  { %3035 = vmatprep.subr.bf16.mxu1 %v3490_v1  ;;  %v3423_v44 = vld [vmem:[%s4069_s3 + $0xa0] sm:$0xff]   ;;  %v492_v45 = vld [vmem:[%s4067_s1 + $0x8] sm:$0xf]  ;;  %v3425_v47 = vld [vmem:[%s4069_s3 + $0xf8] sm:$0xff]  }
  0x39   :  { %v3426_v48 = vld [vmem:[%s4069_s3 + $0xd0] sm:$0xff]   ;;  %v3428_v50 = vld [vmem:[%s4069_s3 + $0xc8] sm:$0xff]   ;;  %v3430_v52 = vld [vmem:[%s4069_s3 + $0xc0] sm:$0xff]  }
  0x3a   :  { %3024 = vmatpush3.bf16.msra.mxu0 %v3396_v14  ;;  %v3427_v49 = vld [vmem:[%s4069_s3 + $0xf0] sm:$0xff]   ;;  %v3429_v51 = vld [vmem:[%s4069_s3 + $0xe8] sm:$0xff]   ;;  %v3431_v53 = vld [vmem:[%s4069_s3 + $0xe0] sm:$0xff]  }
  0x3b   :  { %3036 = vmatpush3.bf16.msra.mxu1 %v3397_v15  ;;  %3025 = vmatprep.subr.bf16.mxu0 %v3490_v1  ;;  %v493_v54 = vld [vmem:[%s4067_s1 + $0xc] sm:$0xf] }
  0x3c   :  { %3037 = vmatprep.subr.bf16.mxu1 %v3490_v1 }
  0x3e   :  { %3026 = vmatpush3.bf16.msra.mxu0 %v3398_v16 }
  0x3f   :  { %3038 = vmatpush3.bf16.msra.mxu1 %v3399_v17  ;;  %3043 = vmatprep.subr.bf16.mxu0 %v3490_v1 }
  0x40   :  { %3055 = vmatprep.subr.bf16.mxu1 %v3490_v1 }
  0x41   :  { %3028 = vmatmul.mubr.msk.bf16.vlgmr.msra.gmra.mxu0 %vm83_vm1, %v26_v18 }
  0x42   :  { %3040 = vmatmul.mubr.msk.bf16.vlgmr.msra.gmra.mxu1 %vm83_vm1, %v26_v18  ;;  %3044 = vmatpush3.bf16.msra.mxu0 %v3400_v19 }
  0x43   :  { %3056 = vmatpush3.bf16.msra.mxu1 %v3401_v20  ;;  %3045 = vmatprep.subr.bf16.mxu0 %v3490_v1 }
  0x44   :  { %3057 = vmatprep.subr.bf16.mxu1 %v3490_v1  ;;  %3051 = vmatprep.mubr.msk.bf16.mxu0 %vm3491_vm0, %v3490_v1 }
  0x45   :  { %3063 = vmatprep.mubr.msk.bf16.mxu1 %vm3491_vm0, %v3490_v1 }
  0x46   :  { %3046 = vmatpush3.bf16.msra.mxu0 %v3402_v21 }
  0x47   :  { %3058 = vmatpush3.bf16.msra.mxu1 %v3403_v22  ;;  %3047 = vmatprep.subr.bf16.mxu0 %v3490_v1 }
  0x48   :  { %3059 = vmatprep.subr.bf16.mxu1 %v3490_v1 }
  0x4a   :  { %3048 = vmatpush3.bf16.msra.mxu0 %v3404_v23 }
  0x4b   :  { %3060 = vmatpush3.bf16.msra.mxu1 %v3405_v24  ;;  %3049 = vmatprep.subr.bf16.mxu0 %v3490_v1 }
  0x4c   :  { %3061 = vmatprep.subr.bf16.mxu1 %v3490_v1 }
  0x4e   :  { %3050 = vmatpush3.bf16.msra.mxu0 %v3406_v25 }
  0x4f   :  { %3062 = vmatpush3.bf16.msra.mxu1 %v3407_v26  ;;  %3067 = vmatprep.subr.bf16.mxu0 %v3490_v1 }
  0x50   :  { %3079 = vmatprep.subr.bf16.mxu1 %v3490_v1 }
  0x51   :  { %3052 = vmatmul.mubr.msk.bf16.vlgmr.msra.gmra.mxu0 %vm83_vm1, %v490_v27 }
  0x52   :  { %3064 = vmatmul.mubr.msk.bf16.vlgmr.msra.gmra.mxu1 %vm83_vm1, %v490_v27  ;;  %3068 = vmatpush3.bf16.msra.mxu0 %v3408_v28 }
  0x53   :  { %3080 = vmatpush3.bf16.msra.mxu1 %v3409_v29  ;;  %3069 = vmatprep.subr.bf16.mxu0 %v3490_v1 }
  0x54   :  { %3081 = vmatprep.subr.bf16.mxu1 %v3490_v1  ;;  %3075 = vmatprep.mubr.msk.bf16.mxu0 %vm3491_vm0, %v3490_v1 }
  0x55   :  { %3087 = vmatprep.mubr.msk.bf16.mxu1 %vm3491_vm0, %v3490_v1 }
  0x56   :  { %3070 = vmatpush3.bf16.msra.mxu0 %v3410_v30 }
  0x57   :  { %3082 = vmatpush3.bf16.msra.mxu1 %v3411_v31  ;;  %3071 = vmatprep.subr.bf16.mxu0 %v3490_v1 }
  0x58   :  { %3083 = vmatprep.subr.bf16.mxu1 %v3490_v1 }
  0x5a   :  { %3072 = vmatpush3.bf16.msra.mxu0 %v3412_v32 }
  0x5b   :  { %3084 = vmatpush3.bf16.msra.mxu1 %v3413_v33  ;;  %3073 = vmatprep.subr.bf16.mxu0 %v3490_v1 }
  0x5c   :  { %3085 = vmatprep.subr.bf16.mxu1 %v3490_v1 }
  0x5e   :  { %3074 = vmatpush3.bf16.msra.mxu0 %v3414_v34 }
  0x5f   :  { %3086 = vmatpush3.bf16.msra.mxu1 %v3415_v35  ;;  %3091 = vmatprep.subr.bf16.mxu0 %v3490_v1 }
  0x60   :  { %3103 = vmatprep.subr.bf16.mxu1 %v3490_v1 }
  0x61   :  { %3076 = vmatmul.mubr.msk.bf16.vlgmr.msra.gmra.mxu0 %vm83_vm1, %v490_v27 }
  0x62   :  { %3088 = vmatmul.mubr.msk.bf16.vlgmr.msra.gmra.mxu1 %vm83_vm1, %v490_v27  ;;  %3092 = vmatpush3.bf16.msra.mxu0 %v3400_v19 }
  0x63   :  { %3104 = vmatpush3.bf16.msra.mxu1 %v3401_v20  ;;  %3093 = vmatprep.subr.bf16.mxu0 %v3490_v1 }
  0x64   :  { %3105 = vmatprep.subr.bf16.mxu1 %v3490_v1  ;;  %3099 = vmatprep.mubr.msk.bf16.mxu0 %vm3491_vm0, %v3490_v1 }
  0x65   :  { %3111 = vmatprep.mubr.msk.bf16.mxu1 %vm3491_vm0, %v3490_v1 }
  0x66   :  { %3094 = vmatpush3.bf16.msra.mxu0 %v3402_v21 }
  0x67   :  { %3106 = vmatpush3.bf16.msra.mxu1 %v3403_v22  ;;  %3095 = vmatprep.subr.bf16.mxu0 %v3490_v1 }
  0x68   :  { %3107 = vmatprep.subr.bf16.mxu1 %v3490_v1 }
  0x6a   :  { %3096 = vmatpush3.bf16.msra.mxu0 %v3404_v23 }
  0x6b   :  { %3108 = vmatpush3.bf16.msra.mxu1 %v3405_v24  ;;  %3097 = vmatprep.subr.bf16.mxu0 %v3490_v1 }
  0x6c   :  { %3109 = vmatprep.subr.bf16.mxu1 %v3490_v1 }
  0x6e   :  { %3098 = vmatpush3.bf16.msra.mxu0 %v3406_v25 }
  0x6f   :  { %3110 = vmatpush3.bf16.msra.mxu1 %v3407_v26  ;;  %3115 = vmatprep.subr.bf16.mxu0 %v3490_v1 }
  0x70   :  { %3127 = vmatprep.subr.bf16.mxu1 %v3490_v1 }
  0x71   :  { %3100 = vmatmul.mubr.msk.bf16.vlgmr.msra.gmra.mxu0 %vm83_vm1, %v491_v36 }
  0x72   :  { %3112 = vmatmul.mubr.msk.bf16.vlgmr.msra.gmra.mxu1 %vm83_vm1, %v491_v36  ;;  %3116 = vmatpush3.bf16.msra.mxu0 %v3408_v28 }
  0x73   :  { %3128 = vmatpush3.bf16.msra.mxu1 %v3409_v29  ;;  %3117 = vmatprep.subr.bf16.mxu0 %v3490_v1 }
  0x74   :  { %3129 = vmatprep.subr.bf16.mxu1 %v3490_v1  ;;  %3123 = vmatprep.mubr.msk.bf16.mxu0 %vm3491_vm0, %v3490_v1 }
  0x75   :  { %3135 = vmatprep.mubr.msk.bf16.mxu1 %vm3491_vm0, %v3490_v1 }
  0x76   :  { %3118 = vmatpush3.bf16.msra.mxu0 %v3410_v30 }
  0x77   :  { %3130 = vmatpush3.bf16.msra.mxu1 %v3411_v31  ;;  %3119 = vmatprep.subr.bf16.mxu0 %v3490_v1 }
  0x78   :  { %3131 = vmatprep.subr.bf16.mxu1 %v3490_v1 }
  0x7a   :  { %3120 = vmatpush3.bf16.msra.mxu0 %v3412_v32 }
  0x7b   :  { %3132 = vmatpush3.bf16.msra.mxu1 %v3413_v33  ;;  %3121 = vmatprep.subr.bf16.mxu0 %v3490_v1 }
  0x7c   :  { %3133 = vmatprep.subr.bf16.mxu1 %v3490_v1 }
  0x7e   :  { %3122 = vmatpush3.bf16.msra.mxu0 %v3414_v34 }
  0x7f   :  { %3134 = vmatpush3.bf16.msra.mxu1 %v3415_v35  ;;  %3139 = vmatprep.subr.bf16.mxu0 %v3490_v1 }
  0x80   :  { %3151 = vmatprep.subr.bf16.mxu1 %v3490_v1 }
  0x81   :  { %3124 = vmatmul.mubr.msk.bf16.vlgmr.msra.gmra.mxu0 %vm83_vm1, %v491_v36 }
  0x82   :  { %3136 = vmatmul.mubr.msk.bf16.vlgmr.msra.gmra.mxu1 %vm83_vm1, %v491_v36  ;;  %3140 = vmatpush3.bf16.msra.mxu0 %v3416_v37 }
  0x83   :  { %3152 = vmatpush3.bf16.msra.mxu1 %v3417_v38  ;;  %3141 = vmatprep.subr.bf16.mxu0 %v3490_v1 }
  0x84   :  { %3153 = vmatprep.subr.bf16.mxu1 %v3490_v1  ;;  %3147 = vmatprep.mubr.msk.bf16.mxu0 %vm3491_vm0, %v3490_v1 }
  0x85   :  { %3159 = vmatprep.mubr.msk.bf16.mxu1 %vm3491_vm0, %v3490_v1 }
  0x86   :  { %3142 = vmatpush3.bf16.msra.mxu0 %v3418_v39 }
  0x87   :  { %3154 = vmatpush3.bf16.msra.mxu1 %v3419_v40  ;;  %3143 = vmatprep.subr.bf16.mxu0 %v3490_v1 }
  0x88   :  { %3155 = vmatprep.subr.bf16.mxu1 %v3490_v1 }
  0x8a   :  { %3144 = vmatpush3.bf16.msra.mxu0 %v3420_v41 }
  0x8b   :  { %3156 = vmatpush3.bf16.msra.mxu1 %v3421_v42  ;;  %3145 = vmatprep.subr.bf16.mxu0 %v3490_v1 }
  0x8c   :  { %3157 = vmatprep.subr.bf16.mxu1 %v3490_v1 }
  0x8e   :  { %3146 = vmatpush3.bf16.msra.mxu0 %v3422_v43 }
  0x8f   :  { %3158 = vmatpush3.bf16.msra.mxu1 %v3423_v44  ;;  %3163 = vmatprep.subr.bf16.mxu0 %v3490_v1 }
  0x90   :  { %3175 = vmatprep.subr.bf16.mxu1 %v3490_v1 }
  0x91   :  { %3148 = vmatmul.mubr.msk.bf16.vlgmr.msra.gmra.mxu0 %vm83_vm1, %v492_v45 }
  0x92   :  { %3160 = vmatmul.mubr.msk.bf16.vlgmr.msra.gmra.mxu1 %vm83_vm1, %v492_v45  ;;  %3164 = vmatpush3.bf16.msra.mxu0 %v3424_v46 }
  0x93   :  { %3176 = vmatpush3.bf16.msra.mxu1 %v3425_v47  ;;  %3165 = vmatprep.subr.bf16.mxu0 %v3490_v1 }
  0x94   :  { %3177 = vmatprep.subr.bf16.mxu1 %v3490_v1  ;;  %3171 = vmatprep.mubr.msk.bf16.mxu0 %vm3491_vm0, %v3490_v1 }
  0x95   :  { %3183 = vmatprep.mubr.msk.bf16.mxu1 %vm3491_vm0, %v3490_v1 }
  0x96   :  { %3166 = vmatpush3.bf16.msra.mxu0 %v3426_v48 }
  0x97   :  { %3178 = vmatpush3.bf16.msra.mxu1 %v3427_v49  ;;  %3167 = vmatprep.subr.bf16.mxu0 %v3490_v1 }
  0x98   :  { %3179 = vmatprep.subr.bf16.mxu1 %v3490_v1 }
  0x9a   :  { %3168 = vmatpush3.bf16.msra.mxu0 %v3428_v50 }
  0x9b   :  { %3180 = vmatpush3.bf16.msra.mxu1 %v3429_v51  ;;  %3169 = vmatprep.subr.bf16.mxu0 %v3490_v1 }
  0x9c   :  { %3181 = vmatprep.subr.bf16.mxu1 %v3490_v1 }
  0x9e   :  { %3170 = vmatpush3.bf16.msra.mxu0 %v3430_v52 }
  0x9f   :  { %3182 = vmatpush3.bf16.msra.mxu1 %v3431_v53  ;;  %3187 = vmatprep.subr.bf16.mxu0 %v3490_v1 }
  0xa0   :  { %3199 = vmatprep.subr.bf16.mxu1 %v3490_v1 }
  0xa1   :  { %3172 = vmatmul.mubr.msk.bf16.vlgmr.msra.gmra.mxu0 %vm83_vm1, %v492_v45 }
  0xa2   :  { %3184 = vmatmul.mubr.msk.bf16.vlgmr.msra.gmra.mxu1 %vm83_vm1, %v492_v45  ;;  %3188 = vmatpush3.bf16.msra.mxu0 %v3416_v37 }
  0xa3   :  { %3200 = vmatpush3.bf16.msra.mxu1 %v3417_v38  ;;  %3189 = vmatprep.subr.bf16.mxu0 %v3490_v1 }
  0xa4   :  { %3201 = vmatprep.subr.bf16.mxu1 %v3490_v1  ;;  %3195 = vmatprep.mubr.msk.bf16.mxu0 %vm3491_vm0, %v3490_v1 }
  0xa5   :  { %3207 = vmatprep.mubr.msk.bf16.mxu1 %vm3491_vm0, %v3490_v1 }
  0xa6   :  { %3190 = vmatpush3.bf16.msra.mxu0 %v3418_v39 }
  0xa7   :  { %3202 = vmatpush3.bf16.msra.mxu1 %v3419_v40  ;;  %3191 = vmatprep.subr.bf16.mxu0 %v3490_v1 }
  0xa8   :  { %3203 = vmatprep.subr.bf16.mxu1 %v3490_v1 }
  0xaa   :  { %3192 = vmatpush3.bf16.msra.mxu0 %v3420_v41 }
  0xab   :  { %3204 = vmatpush3.bf16.msra.mxu1 %v3421_v42  ;;  %3193 = vmatprep.subr.bf16.mxu0 %v3490_v1 }
  0xac   :  { %3205 = vmatprep.subr.bf16.mxu1 %v3490_v1 }
  0xae   :  { %3194 = vmatpush3.bf16.msra.mxu0 %v3422_v43 }
  0xaf   :  { %3206 = vmatpush3.bf16.msra.mxu1 %v3423_v44  ;;  %3211 = vmatprep.subr.bf16.mxu0 %v3490_v1 }
  0xb0   :  { %3223 = vmatprep.subr.bf16.mxu1 %v3490_v1 }
  0xb1   :  { %3196 = vmatmul.mubr.msk.bf16.vlgmr.msra.gmra.mxu0 %vm83_vm1, %v493_v54 }
  0xb2   :  { %3208 = vmatmul.mubr.msk.bf16.vlgmr.msra.gmra.mxu1 %vm83_vm1, %v493_v54  ;;  %3212 = vmatpush3.bf16.msra.mxu0 %v3424_v46 }
  0xb3   :  { %3224 = vmatpush3.bf16.msra.mxu1 %v3425_v47  ;;  %3213 = vmatprep.subr.bf16.mxu0 %v3490_v1 }
  0xb4   :  { %3225 = vmatprep.subr.bf16.mxu1 %v3490_v1  ;;  %3219 = vmatprep.mubr.msk.bf16.mxu0 %vm3491_vm0, %v3490_v1 }
  0xb5   :  { %3231 = vmatprep.mubr.msk.bf16.mxu1 %vm3491_vm0, %v3490_v1 }
  0xb6   :  { %3214 = vmatpush3.bf16.msra.mxu0 %v3426_v48 }
  0xb7   :  { %3226 = vmatpush3.bf16.msra.mxu1 %v3427_v49  ;;  %3215 = vmatprep.subr.bf16.mxu0 %v3490_v1 }
  0xb8   :  { %3227 = vmatprep.subr.bf16.mxu1 %v3490_v1 }
  0xba   :  { %3216 = vmatpush3.bf16.msra.mxu0 %v3428_v50 }
  0xbb   :  { %3228 = vmatpush3.bf16.msra.mxu1 %v3429_v51  ;;  %3217 = vmatprep.subr.bf16.mxu0 %v3490_v1 }
  0xbc   :  { %3229 = vmatprep.subr.bf16.mxu1 %v3490_v1 }
  0xbe   :  { %3218 = vmatpush3.bf16.msra.mxu0 %v3430_v52 }
  0xbf   :  { %3230 = vmatpush3.bf16.msra.mxu1 %v3431_v53  ;;  %3235 = vmatprep.subr.bf16.mxu0 %v3490_v1 }
  0xc0   :  { %3241 = vmatprep.subr.bf16.mxu1 %v3490_v1 }
  0xc1   :  { %3220 = vmatmul.mubr.msk.bf16.vlgmr.msra.gmra.mxu0 %vm83_vm1, %v493_v54 }
  0xc2   :  { %3232 = vmatmul.mubr.msk.bf16.vlgmr.msra.gmra.mxu1 %vm83_vm1, %v493_v54  ;;  %3237 = vmatprep.mubr.msk.bf16.mxu0 %vm3491_vm0, %v3490_v1 }
  0xc3   :  { %3243 = vmatprep.mubr.msk.bf16.mxu1 %vm3491_vm0, %v3490_v1 }
  0xd1   :  { %v121_v55 = vpop.f32.mrf.mxu0 }
  0xd2   :  { %v185_v56 = vpop.f32.mrf.mxu1  ;;  %v482_v36 = vpack.c.bf16 %v121_v55, %v121_v55 }
  0xd3   :  { %v2957_v57 = vpop.f32.mrf.mxu0  ;;  %v483_v37 = vpack.c.bf16 %v185_v56, %v185_v56 }
  0xd4   :  { %v2969_v58 = vpop.f32.mrf.mxu1 }
  0xd5   :  { %v124_v59 = vpop.f32.mrf.mxu0 }
  0xd6   :  { %v188_v60 = vpop.f32.mrf.mxu1 }
  0xd7   :  { %v2958_v61 = vpop.f32.mrf.mxu0 }
  0xd8   :  { %v2970_v62 = vpop.f32.mrf.mxu1 }
  0xe1   :  { %v3866_v63 = vpop.f32.mrf.mxu0 }
  0xe2   :  { %v3868_v0 = vpop.f32.mrf.mxu1  ;;  %v484_v50 = vpack.c.bf16 %v3866_v63, %v3866_v63 }
  0xe3   :  { %v2981_v2 = vpop.f32.mrf.mxu0  ;;  %v485_v51 = vpack.c.bf16 %v3868_v0, %v3868_v0 }
  0xe4   :  { %v2993_v3 = vpop.f32.mrf.mxu1 }
  0xe5   :  { %v252_v4 = vpop.f32.mrf.mxu0 }
  0xe6   :  { %v316_v5 = vpop.f32.mrf.mxu1 }
  0xe7   :  { %v2982_v6 = vpop.f32.mrf.mxu0 }
  0xe8   :  { %v2994_v7 = vpop.f32.mrf.mxu1 }
  0xf1   :  { %v3870_v8 = vpop.f32.mrf.mxu0 }
  0xf2   :  { %v3872_v9 = vpop.f32.mrf.mxu1  ;;  %v486_v0 = vpack.c.bf16 %v3870_v8, %v3870_v8 }
  0xf3   :  { %v3005_v10 = vpop.f32.mrf.mxu0  ;;  %v487_v2 = vpack.c.bf16 %v3872_v9, %v3872_v9 }
  0xf4   :  { %v3017_v11 = vpop.f32.mrf.mxu1 }
  0xf5   :  { %v359_v12 = vpop.f32.mrf.mxu0 }
  0xf6   :  { %v399_v13 = vpop.f32.mrf.mxu1 }
  0xf7   :  { %v3006_v14 = vpop.f32.mrf.mxu0 }
  0xf8   :  { %v3018_v15 = vpop.f32.mrf.mxu1 }
 0x101   :  { %v3874_v16 = vpop.f32.mrf.mxu0 }
 0x102   :  { %v3876_v17 = vpop.f32.mrf.mxu1  ;;  %v488_v15 = vpack.c.bf16 %v3874_v16, %v3874_v16 }
 0x103   :  { %v3029_v18 = vpop.f32.mrf.mxu0 }
 0x104   :  { %v3041_v19 = vpop.f32.mrf.mxu1  ;;  %v489_v18 = vpack.c.bf16 %v3876_v17, %v3876_v17 }
 0x105   :  { %v439_v20 = vpop.f32.mrf.mxu0 }
 0x106   :  { %v479_v21 = vpop.f32.mrf.mxu1 }
 0x107   :  { %v3030_v22 = vpop.f32.mrf.mxu0 }
 0x108   :  { %v3042_v23 = vpop.f32.mrf.mxu1 }
 0x111   :  { %v619_v24 = vpop.f32.mrf.mxu0 }
 0x112   :  { %v1402_v25 = vpack.c.bf16 %v619_v24, %v619_v24  ;;  %v683_v26 = vpop.f32.mrf.mxu1 }
 0x113   :  { %v1403_v27 = vpack.c.bf16 %v683_v26, %v683_v26  ;;  %v3053_v28 = vpop.f32.mrf.mxu0 }
 0x114   :  { %v1423_v29 = vsel %vm1418_vm2, %v1402_v25, 0  ;;  %v3065_v30 = vpop.f32.mrf.mxu1 }
 0x115   :  { %v1469_v31 = vsel %vm1418_vm2, %v1403_v27, 0  ;;  %v622_v32 = vpop.f32.mrf.mxu0  ;;  %3236 = vmatpush3.bf16.xpose.msra.mxu0 %v1423_v29 }
 0x116   :  { %v686_v33 = vpop.f32.mrf.mxu1  ;;  %3242 = vmatpush3.bf16.xpose.msra.mxu1 %v1469_v31  ;;  %3247 = vmatprep.subr.bf16.mxu0 %v3490_v1 }
 0x117   :  { %v3054_v34 = vpop.f32.mrf.mxu0  ;;  %3253 = vmatprep.subr.bf16.mxu1 %v3490_v1 }
 0x118   :  { %v3066_v35 = vpop.f32.mrf.mxu1 }
 0x11c   :  { %3238 = vmatmul.mubr.msk.bf16.vlgmr.msra.gmra.mxu0 %vm1418_vm2, %v482_v36 }
 0x11d   :  { %3244 = vmatmul.mubr.msk.bf16.vlgmr.msra.gmra.mxu1 %vm1418_vm2, %v483_v37  ;;  %3249 = vmatprep.mubr.msk.bf16.mxu0 %vm3491_vm0, %v3490_v1 }
 0x11e   :  { %3255 = vmatprep.mubr.msk.bf16.mxu1 %vm3491_vm0, %v3490_v1 }
 0x121   :  { %v747_v38 = vpop.f32.mrf.mxu0 }
 0x122   :  { %v1404_v39 = vpack.c.bf16 %v747_v38, %v747_v38  ;;  %v811_v40 = vpop.f32.mrf.mxu1 }
 0x123   :  { %v1405_v41 = vpack.c.bf16 %v811_v40, %v811_v40  ;;  %v3077_v42 = vpop.f32.mrf.mxu0 }
 0x124   :  { %v1515_v43 = vsel %vm1418_vm2, %v1404_v39, 0  ;;  %v3089_v44 = vpop.f32.mrf.mxu1 }
 0x125   :  { %v1561_v45 = vsel %vm1418_vm2, %v1405_v41, 0  ;;  %v750_v46 = vpop.f32.mrf.mxu0  ;;  %3248 = vmatpush3.bf16.xpose.msra.mxu0 %v1515_v43 }
 0x126   :  { %v814_v47 = vpop.f32.mrf.mxu1  ;;  %3254 = vmatpush3.bf16.xpose.msra.mxu1 %v1561_v45  ;;  %3259 = vmatprep.subr.bf16.mxu0 %v3490_v1 }
 0x127   :  { %v3078_v48 = vpop.f32.mrf.mxu0  ;;  %3265 = vmatprep.subr.bf16.mxu1 %v3490_v1 }
 0x128   :  { %v3090_v49 = vpop.f32.mrf.mxu1 }
 0x12c   :  { %3250 = vmatmul.mubr.msk.bf16.vlgmr.msra.gmra.mxu0 %vm1418_vm2, %v484_v50 }
 0x12d   :  { %3256 = vmatmul.mubr.msk.bf16.vlgmr.msra.gmra.mxu1 %vm1418_vm2, %v485_v51  ;;  %3261 = vmatprep.mubr.msk.bf16.mxu0 %vm3491_vm0, %v3490_v1 }
 0x12e   :  { %3267 = vmatprep.mubr.msk.bf16.mxu1 %vm3491_vm0, %v3490_v1 }
 0x131   :  { %v854_v52 = vpop.f32.mrf.mxu0 }
 0x132   :  { %v1406_v53 = vpack.c.bf16 %v854_v52, %v854_v52  ;;  %v894_v54 = vpop.f32.mrf.mxu1 }
 0x133   :  { %v1407_v55 = vpack.c.bf16 %v894_v54, %v894_v54  ;;  %v3101_v56 = vpop.f32.mrf.mxu0 }
 0x134   :  { %v1607_v57 = vsel %vm1418_vm2, %v1406_v53, 0  ;;  %v3113_v58 = vpop.f32.mrf.mxu1 }
 0x135   :  { %v1653_v59 = vsel %vm1418_vm2, %v1407_v55, 0  ;;  %v857_v60 = vpop.f32.mrf.mxu0  ;;  %3260 = vmatpush3.bf16.xpose.msra.mxu0 %v1607_v57 }
 0x136   :  { %v897_v61 = vpop.f32.mrf.mxu1  ;;  %3266 = vmatpush3.bf16.xpose.msra.mxu1 %v1653_v59  ;;  %3271 = vmatprep.subr.bf16.mxu0 %v3490_v1 }
 0x137   :  { %v3102_v62 = vpop.f32.mrf.mxu0  ;;  %3277 = vmatprep.subr.bf16.mxu1 %v3490_v1 }
 0x138   :  { %v3114_v63 = vpop.f32.mrf.mxu1 }
 0x13c   :  { %3262 = vmatmul.mubr.msk.bf16.vlgmr.msra.gmra.mxu0 %vm1418_vm2, %v486_v0 }
 0x13d   :  { %3268 = vmatmul.mubr.msk.bf16.vlgmr.msra.gmra.mxu1 %vm1418_vm2, %v487_v2  ;;  %3273 = vmatprep.mubr.msk.bf16.mxu0 %vm3491_vm0, %v3490_v1 }
 0x13e   :  { %3279 = vmatprep.mubr.msk.bf16.mxu1 %vm3491_vm0, %v3490_v1 }
 0x141   :  { %v934_v3 = vpop.f32.mrf.mxu0 }
 0x142   :  { %v1408_v4 = vpack.c.bf16 %v934_v3, %v934_v3  ;;  %v974_v5 = vpop.f32.mrf.mxu1 }
 0x143   :  { %v1409_v6 = vpack.c.bf16 %v974_v5, %v974_v5  ;;  %v3125_v7 = vpop.f32.mrf.mxu0 }
 0x144   :  { %v1699_v8 = vsel %vm1418_vm2, %v1408_v4, 0  ;;  %v3137_v10 = vpop.f32.mrf.mxu1 }
 0x145   :  { %v1745_v9 = vsel %vm1418_vm2, %v1409_v6, 0  ;;  %v937_v11 = vpop.f32.mrf.mxu0  ;;  %3272 = vmatpush3.bf16.xpose.msra.mxu0 %v1699_v8 }
 0x146   :  { %v977_v12 = vpop.f32.mrf.mxu1  ;;  %3278 = vmatpush3.bf16.xpose.msra.mxu1 %v1745_v9  ;;  %3283 = vmatprep.subr.bf16.mxu0 %v3490_v1 }
 0x147   :  { %v3126_v13 = vpop.f32.mrf.mxu0  ;;  %3289 = vmatprep.subr.bf16.mxu1 %v3490_v1 }
 0x148   :  { %v3138_v14 = vpop.f32.mrf.mxu1 }
 0x14c   :  { %3274 = vmatmul.mubr.msk.bf16.vlgmr.msra.gmra.mxu0 %vm1418_vm2, %v488_v15 }
 0x14d   :  { %3280 = vmatmul.mubr.msk.bf16.vlgmr.msra.gmra.mxu1 %vm1418_vm2, %v489_v18  ;;  %3285 = vmatprep.mubr.msk.bf16.mxu0 %vm3491_vm0, %v3490_v1 }
 0x14e   :  { %3291 = vmatprep.mubr.msk.bf16.mxu1 %vm3491_vm0, %v3490_v1 }
 0x151   :  { %v1041_v19 = vpop.f32.mrf.mxu0 }
 0x152   :  { %v1410_v20 = vpack.c.bf16 %v1041_v19, %v1041_v19  ;;  %v1105_v21 = vpop.f32.mrf.mxu1 }
 0x153   :  { %v3149_v22 = vpop.f32.mrf.mxu0  ;;  %v1411_v23 = vpack.c.bf16 %v1105_v21, %v1105_v21 }
 0x154   :  { %v1889_v16 = vsel %vm1887_vm3, %v1410_v20, 0  ;;  %v3161_v24 = vpop.f32.mrf.mxu1 }
 0x155   :  { %v1044_v17 = vpop.f32.mrf.mxu0  ;;  %v1935_v25 = vsel %vm1887_vm3, %v1411_v23, 0  ;;  %3284 = vmatpush3.bf16.msra.mxu0 %v1889_v16 }
 0x156   :  { %v1108_v26 = vpop.f32.mrf.mxu1  ;;  %3290 = vmatpush3.bf16.msra.mxu1 %v1935_v25  ;;  %3295 = vmatprep.subr.bf16.mxu0 %v3490_v1 }
 0x157   :  { %v3150_v27 = vpop.f32.mrf.mxu0  ;;  %3301 = vmatprep.subr.bf16.mxu1 %v3490_v1 }
 0x158   :  { %v3162_v28 = vpop.f32.mrf.mxu1 }
 0x161   :  { %v1169_v29 = vpop.f32.mrf.mxu0 }
 0x162   :  { %v1412_v30 = vpack.c.bf16 %v1169_v29, %v1169_v29  ;;  %v1233_v31 = vpop.f32.mrf.mxu1 }
 0x163   :  { %v1413_v32 = vpack.c.bf16 %v1233_v31, %v1233_v31  ;;  %v3173_v33 = vpop.f32.mrf.mxu0 }
 0x164   :  { %v3935_v34 = vsel %vm1887_vm3, %v1412_v30, 0  ;;  %v3185_v35 = vpop.f32.mrf.mxu1 }
 0x165   :  { %v3938_v36 = vsel %vm1887_vm3, %v1413_v32, 0  ;;  %v1172_v37 = vpop.f32.mrf.mxu0 }
 0x166   :  { %v1236_v38 = vpop.f32.mrf.mxu1 }
 0x167   :  { %v3174_v39 = vpop.f32.mrf.mxu0 }
 0x168   :  { %v3186_v40 = vpop.f32.mrf.mxu1 }
 0x171   :  { %v1276_v41 = vpop.f32.mrf.mxu0 }
 0x172   :  { %v1414_v42 = vpack.c.bf16 %v1276_v41, %v1276_v41  ;;  %v1316_v43 = vpop.f32.mrf.mxu1 }
 0x173   :  { %v1415_v44 = vpack.c.bf16 %v1316_v43, %v1316_v43  ;;  %v3197_v45 = vpop.f32.mrf.mxu0 }
 0x174   :  { %v3941_v46 = vsel %vm1887_vm3, %v1414_v42, 0  ;;  %v3209_v47 = vpop.f32.mrf.mxu1 }
 0x175   :  { %v3944_v48 = vsel %vm1887_vm3, %v1415_v44, 0  ;;  %v1279_v49 = vpop.f32.mrf.mxu0 }
 0x176   :  { %v1319_v50 = vpop.f32.mrf.mxu1 }
 0x177   :  { %v3198_v51 = vpop.f32.mrf.mxu0 }
 0x178   :  { %v3210_v52 = vpop.f32.mrf.mxu1 }
 0x181   :  { %v1356_v53 = vpop.f32.mrf.mxu0 }
 0x182   :  { %v1416_v54 = vpack.c.bf16 %v1356_v53, %v1356_v53  ;;  %v1396_v55 = vpop.f32.mrf.mxu1 }
 0x183   :  { %v1417_v56 = vpack.c.bf16 %v1396_v55, %v1396_v55  ;;  %v3221_v57 = vpop.f32.mrf.mxu0 }
 0x184   :  { %v3947_v58 = vsel %vm1887_vm3, %v1416_v54, 0  ;;  %v3233_v59 = vpop.f32.mrf.mxu1 }
 0x185   :  { %v3950_v60 = vsel %vm1887_vm3, %v1417_v56, 0  ;;  %v1359_v61 = vpop.f32.mrf.mxu0 }
 0x186   :  { %v1399_v62 = vpop.f32.mrf.mxu1 }
 0x187   :  { %v3222_v63 = vpop.f32.mrf.mxu0 }
 0x188   :  { %v3234_v0 = vpop.f32.mrf.mxu1 }
 0x1dc   :  { %v1459_v2 = vpop.f32.mrf.mxu0 }
 0x1dd   :  { %v1505_v3 = vpop.f32.mrf.mxu1  ;;  %v1788_v4 = vsel %vm1787_vm4, %v1459_v2, -inf }
 0x1de   :  { %1789 = vmax.xlane.f32.xlu0 %v1788_v4  ;;  %v3239_v5 = vpop.f32.mrf.mxu0  ;;  %v1791_v10 = vsel %vm1787_vm4, %v1505_v3, -inf }
 0x1df   :  { %v3245_v6 = vpop.f32.mrf.mxu1 }
 0x1e0   :  { %v1462_v7 = vpop.f32.mrf.mxu0 }
 0x1e1   :  { %v1508_v8 = vpop.f32.mrf.mxu1 }
 0x1e2   :  { %1792 = vmax.xlane.f32.xlu0 %v1791_v10  ;;  %v3240_v9 = vpop.f32.mrf.mxu0 }
 0x1e3   :  { %v3246_v11 = vpop.f32.mrf.mxu1 }
 0x1ec   :  { %v1551_v12 = vpop.f32.mrf.mxu0 }
 0x1ed   :  { %v1597_v13 = vpop.f32.mrf.mxu1  ;;  %v1794_v14 = vsel %vm1787_vm4, %v1551_v12, -inf }
 0x1ee   :  { %1795 = vmax.xlane.f32.xlu1 %v1794_v14  ;;  %v3251_v15 = vpop.f32.mrf.mxu0  ;;  %v1797_v21 = vsel %vm1787_vm4, %v1597_v13, -inf }
 0x1ef   :  { %v3257_v18 = vpop.f32.mrf.mxu1 }
 0x1f0   :  { %v1554_v19 = vpop.f32.mrf.mxu0 }
 0x1f1   :  { %v1600_v20 = vpop.f32.mrf.mxu1 }
 0x1f2   :  { %1798 = vmax.xlane.f32.xlu1 %v1797_v21  ;;  %v3252_v22 = vpop.f32.mrf.mxu0 }
 0x1f3   :  { %v3258_v23 = vpop.f32.mrf.mxu1 }
 0x1fc   :  { %v1643_v16 = vpop.f32.mrf.mxu0 }
 0x1fd   :  { %v1689_v24 = vpop.f32.mrf.mxu1  ;;  %v1800_v17 = vsel %vm1787_vm4, %v1643_v16, -inf }
 0x1fe   :  { %v1803_v25 = vsel %vm1787_vm4, %v1689_v24, -inf  ;;  %1801 = vmax.xlane.f32.xlu0 %v1800_v17  ;;  %v3263_v26 = vpop.f32.mrf.mxu0 }
 0x1ff   :  { %v3269_v27 = vpop.f32.mrf.mxu1  ;;  %1804 = vmax.xlane.f32.xlu1 %v1803_v25 }
 0x200   :  { %v1646_v28 = vpop.f32.mrf.mxu0 }
 0x201   :  { %v1692_v29 = vpop.f32.mrf.mxu1 }
 0x202   :  { %v3264_v30 = vpop.f32.mrf.mxu0 }
 0x203   :  { %v3270_v31 = vpop.f32.mrf.mxu1 }
 0x20c   :  { %v1735_v32 = vpop.f32.mrf.mxu0 }
 0x20d   :  { %v1781_v33 = vpop.f32.mrf.mxu1  ;;  %v1806_v35 = vsel %vm1787_vm4, %v1735_v32, -inf }
 0x20e   :  { %v1809_v37 = vsel %vm1787_vm4, %v1781_v33, -inf  ;;  %1807 = vmax.xlane.f32.xlu0 %v1806_v35  ;;  %v3275_v38 = vpop.f32.mrf.mxu0 }
 0x20f   :  { %v3281_v39 = vpop.f32.mrf.mxu1  ;;  %1810 = vmax.xlane.f32.xlu1 %v1809_v37 }
 0x210   :  { %v1738_v40 = vpop.f32.mrf.mxu0 }
 0x211   :  { %v1784_v41 = vpop.f32.mrf.mxu1 }
 0x212   :  { %v3276_v42 = vpop.f32.mrf.mxu0 }
 0x213   :  { %v3282_v43 = vpop.f32.mrf.mxu1 }
 0x267   :  { %v1790_v44 = vpop.xlane.xlu0 %1789 }
 0x268   :  { %v1812_v45 = vsub.f32 %v1459_v2, %v1790_v44 }
 0x26a   :  { %v1820_v47 = vmul.f32 1.442695, %v1812_v45 }
 0x26b   :  { %v1793_v49 = vpop.xlane.xlu0 %1792 }
 0x26c   :  { %3436 = vpow2.f32 %v1820_v47  ;;  %v1813_v50 = vsub.f32 %v1505_v3, %v1793_v49 }
 0x26e   :  { %v1822_v51 = vmul.f32 1.442695, %v1813_v50 }
 0x270   :  { %3438 = vpow2.f32 %v1822_v51 }
 0x277   :  { %v1796_v52 = vpop.xlane.xlu1 %1795 }
 0x278   :  { %v1814_v53 = vsub.f32 %v1551_v12, %v1796_v52 }
 0x279   :  { %v3437_v54 = vpop.eup %3436 }
 0x27a   :  { %v1824_v55 = vmul.f32 1.442695, %v1814_v53  ;;  %v1836_v56 = vsel %vm1787_vm4, %v3437_v54, 0.0 }
 0x27b   :  { %v1799_v57 = vpop.xlane.xlu1 %1798  ;;  %1837 = vadd.xlane.f32.xlu0 %v1836_v56  ;;  %v3433_v56 = vld [vmem:[%s4070_s4 + $0x8] sm:$0xff]  }
 0x27c   :  { %3440 = vpow2.f32 %v1824_v55  ;;  %v1815_v59 = vsub.f32 %v1597_v13, %v1799_v57 }
 0x27d   :  { %v3439_v61 = vpop.eup %3438 }
 0x27e   :  { %v1826_v62 = vmul.f32 1.442695, %v1815_v59  ;;  %v1839_v63 = vsel %vm1787_vm4, %v3439_v61, 0.0  ;;  %v3434_v59 = vld [vmem:[%s4070_s4 + $0x10] sm:$0xff]  }
 0x27f   :  { %1840 = vadd.xlane.f32.xlu1 %v1839_v63 }
 0x280   :  { %3442 = vpow2.f32 %v1826_v62 }
 0x287   :  { %v1802_v0 = vpop.xlane.xlu0 %1801 }
 0x288   :  { %v1805_v2 = vpop.xlane.xlu1 %1804  ;;  %v1816_v3 = vsub.f32 %v1643_v16, %v1802_v0 }
 0x289   :  { %v3441_v4 = vpop.eup %3440  ;;  %v1817_v5 = vsub.f32 %v1689_v24, %v1805_v2  ;;  %v3435_v2 = vld [vmem:[%s4070_s4 + $0x18] sm:$0xff]  }
 0x28a   :  { %v1828_v6 = vmul.f32 1.442695, %v1816_v3  ;;  %v1842_v7 = vsel %vm1787_vm4, %v3441_v4, 0.0 }
 0x28b   :  { %v1830_v8 = vmul.f32 1.442695, %v1817_v5  ;;  %1843 = vadd.xlane.f32.xlu0 %v1842_v7 }
 0x28c   :  { %3444 = vpow2.f32 %v1828_v6 }
 0x28d   :  { %v3443_v10 = vpop.eup %3442  ;;  %3446 = vpow2.f32 %v1830_v8 }
 0x28e   :  { %v1845_v9 = vsel %vm1787_vm4, %v3443_v10, 0.0 }
 0x28f   :  { %1846 = vadd.xlane.f32.xlu1 %v1845_v9 }
 0x297   :  { %v1808_v11 = vpop.xlane.xlu0 %1807 }
 0x298   :  { %v1811_v12 = vpop.xlane.xlu1 %1810  ;;  %v1818_v13 = vsub.f32 %v1735_v32, %v1808_v11 }
 0x299   :  { %v3445_v14 = vpop.eup %3444  ;;  %v1819_v15 = vsub.f32 %v1781_v33, %v1811_v12 }
 0x29a   :  { %v3447_v18 = vpop.eup %3446  ;;  %v1832_v19 = vmul.f32 1.442695, %v1818_v13  ;;  %v1848_v20 = vsel %vm1787_vm4, %v3445_v14, 0.0 }
 0x29b   :  { %v1834_v21 = vmul.f32 1.442695, %v1819_v15  ;;  %v1851_v22 = vsel %vm1787_vm4, %v3447_v18, 0.0  ;;  %1849 = vadd.xlane.f32.xlu0 %v1848_v20 }
 0x29c   :  { %3448 = vpow2.f32 %v1832_v19  ;;  %1852 = vadd.xlane.f32.xlu1 %v1851_v22 }
 0x29d   :  { %3450 = vpow2.f32 %v1834_v21 }
 0x2a9   :  { %v3966_v23 = vpop.eup %3448 }
 0x2aa   :  { %v3968_v16 = vpop.eup %3450  ;;  %v1854_v24 = vsel %vm1787_vm4, %v3966_v23, 0.0 }
 0x2ab   :  { %v1857_v17 = vsel %vm1787_vm4, %v3968_v16, 0.0  ;;  %1855 = vadd.xlane.f32.xlu0 %v1854_v24 }
 0x2ac   :  { %1858 = vadd.xlane.f32.xlu1 %v1857_v17 }
 0x304   :  { %v1838_v25 = vpop.xlane.xlu0 %1837 }
 0x305   :  { %3452 = vrcp.f32 %v1838_v25 }
 0x308   :  { %v1841_v26 = vpop.xlane.xlu1 %1840 }
 0x309   :  { %3454 = vrcp.f32 %v1841_v26 }
 0x312   :  { %v3453_v27 = vpop.eup %3452 }
 0x313   :  { %v1868_v28 = vmul.f32 %v3453_v27, %v3437_v54 }
 0x314   :  { %v1844_v29 = vpop.xlane.xlu0 %1843 }
 0x315   :  { %3456 = vrcp.f32 %v1844_v29  ;;  %v1876_v30 = vpack.c.bf16 %v1868_v28, %v1868_v28 }
 0x316   :  { %v3455_v31 = vpop.eup %3454 }
 0x317   :  { %3286 = vmatmul.mubr.msk.bf16.vlgmr.msra.gmra.mxu0 %vm1787_vm4, %v1876_v30  ;;  %v1869_v32 = vmul.f32 %v3455_v31, %v3439_v61 }
 0x318   :  { %3296 = vmatpush3.bf16.msra.mxu0 %v3935_v34  ;;  %v1847_v33 = vpop.xlane.xlu1 %1846  ;;  %3297 = vmatprep.mubr.msk.bf16.mxu0 %vm3491_vm0, %v3490_v1 }
 0x319   :  { %3458 = vrcp.f32 %v1847_v33  ;;  %v1877_v35 = vpack.c.bf16 %v1869_v32, %v1869_v32  ;;  %3307 = vmatprep.subr.bf16.mxu0 %v3490_v1 }
 0x31b   :  { %3292 = vmatmul.mubr.msk.bf16.vlgmr.msra.gmra.mxu1 %vm1787_vm4, %v1877_v35 }
 0x31c   :  { %3302 = vmatpush3.bf16.msra.mxu1 %v3938_v36  ;;  %3303 = vmatprep.mubr.msk.bf16.mxu1 %vm3491_vm0, %v3490_v1 }
 0x31d   :  { %3313 = vmatprep.subr.bf16.mxu1 %v3490_v1 }
 0x322   :  { %v3457_v37 = vpop.eup %3456 }
 0x323   :  { %v1870_v38 = vmul.f32 %v3457_v37, %v3441_v4 }
 0x324   :  { %v1850_v34 = vpop.xlane.xlu0 %1849 }
 0x325   :  { %v1853_v39 = vpop.xlane.xlu1 %1852  ;;  %3460 = vrcp.f32 %v1850_v34  ;;  %v1878_v40 = vpack.c.bf16 %v1870_v38, %v1870_v38 }
 0x326   :  { %v3459_v41 = vpop.eup %3458  ;;  %3462 = vrcp.f32 %v1853_v39 }
 0x327   :  { %3298 = vmatmul.mubr.msk.bf16.vlgmr.msra.gmra.mxu0 %vm1787_vm4, %v1878_v40  ;;  %v1871_v42 = vmul.f32 %v3459_v41, %v3443_v10 }
 0x328   :  { %3308 = vmatpush3.bf16.msra.mxu0 %v3941_v46  ;;  %3309 = vmatprep.mubr.msk.bf16.mxu0 %vm3491_vm0, %v3490_v1 }
 0x329   :  { %v1879_v36 = vpack.c.bf16 %v1871_v42, %v1871_v42  ;;  %3319 = vmatprep.subr.bf16.mxu0 %v3490_v1 }
 0x32b   :  { %3304 = vmatmul.mubr.msk.bf16.vlgmr.msra.gmra.mxu1 %vm1787_vm4, %v1879_v36 }
 0x32c   :  { %3314 = vmatpush3.bf16.msra.mxu1 %v3944_v48  ;;  %3315 = vmatprep.mubr.msk.bf16.mxu1 %vm3491_vm0, %v3490_v1 }
 0x32d   :  { %3325 = vmatprep.subr.bf16.mxu1 %v3490_v1 }
 0x332   :  { %v3461_v43 = vpop.eup %3460 }
 0x333   :  { %v3463_v44 = vpop.eup %3462  ;;  %v1872_v45 = vmul.f32 %v3461_v43, %v3445_v14 }
 0x334   :  { %v1856_v47 = vpop.xlane.xlu0 %1855  ;;  %v1873_v46 = vmul.f32 %v3463_v44, %v3447_v18 }
 0x335   :  { %v1859_v49 = vpop.xlane.xlu1 %1858  ;;  %3464 = vrcp.f32 %v1856_v47  ;;  %v1880_v50 = vpack.c.bf16 %v1872_v45, %v1872_v45 }
 0x336   :  { %3466 = vrcp.f32 %v1859_v49  ;;  %v1881_v51 = vpack.c.bf16 %v1873_v46, %v1873_v46 }
 0x337   :  { %3310 = vmatmul.mubr.msk.bf16.vlgmr.msra.gmra.mxu0 %vm1787_vm4, %v1880_v50 }
 0x338   :  { %3316 = vmatmul.mubr.msk.bf16.vlgmr.msra.gmra.mxu1 %vm1787_vm4, %v1881_v51  ;;  %3320 = vmatpush3.bf16.msra.mxu0 %v3947_v58 }
 0x339   :  { %3326 = vmatpush3.bf16.msra.mxu1 %v3950_v60  ;;  %3321 = vmatprep.mubr.msk.bf16.mxu0 %vm3491_vm0, %v3490_v1  ;;  %v3432_v60 = vld [vmem:[%s4070_s4] sm:$0xff]  }
 0x33a   :  { %3327 = vmatprep.mubr.msk.bf16.mxu1 %vm3491_vm0, %v3490_v1  ;;  %3331 = vmatprep.subr.bf16.mxu0 %v3490_v1 }
 0x33b   :  { %3337 = vmatprep.subr.bf16.mxu1 %v3490_v1 }
 0x342   :  { %v3465_v48 = vpop.eup %3464 }
 0x343   :  { %v3467_v52 = vpop.eup %3466  ;;  %v1874_v53 = vmul.f32 %v3465_v48, %v3966_v23 }
 0x344   :  { %v1875_v54 = vmul.f32 %v3467_v52, %v3968_v16 }
 0x345   :  { %v1882_v55 = vpack.c.bf16 %v1874_v53, %v1874_v53 }
 0x346   :  { %v1883_v58 = vpack.c.bf16 %v1875_v54, %v1875_v54 }
 0x347   :  { %3322 = vmatmul.mubr.msk.bf16.vlgmr.msra.gmra.mxu0 %vm1787_vm4, %v1882_v55  ;;  %v2778_v55 = vld [vmem:[%s4071_s5] ss:$0 sm:$0xff]  ;;  %s3492_s5 = smov [#allocation2]  }
 0x348   :  { %3328 = vmatmul.mubr.msk.bf16.vlgmr.msra.gmra.mxu1 %vm1787_vm4, %v1883_v58  ;;  %3333 = vmatprep.mubr.msk.bf16.mxu0 %vm3491_vm0, %v3490_v1  ;;  %s2667_s8 = sshll.u32 %s3492_s5, 4  ;;  %s2668_s8 = int_to_ptr.vmem [resolvable:$true] %s2667_s8 }
 0x349   :  { %3339 = vmatprep.mubr.msk.bf16.mxu1 %vm3491_vm0, %v3490_v1  ;;  %3332 = vmatpush3.bf16.msra.mxu0 %v3432_v60  ;;  %s3468_s9 = scalar_lea.vmem %s2668_s8, 256  ;;  %p3473_p1 = scmp.lt.s32.totalorder %s2668_s8, %s2668_s8 }
 0x34a   :  { %3343 = vmatprep.subr.bf16.mxu0 %v3490_v1  ;;  %3338 = vmatpush3.bf16.msra.mxu1 %v3433_v56  ;;  %p3469_p0 = scmp.ne.s32.totalorder %s2668_s8, %s3468_s9  ;;  %p3474_p2 = scmp.lt.s32.totalorder %s3468_s9, %s3468_s9 }
 0x34b   :  { %3349 = vmatprep.subr.bf16.mxu1 %v3490_v1 }
 0x34c   :  { %p3475_p3 = por %p3474_p2, %p3473_p1 }
 0x34e   :  { %p3476_p4 = pnand %p3475_p3, %p3469_p0 }
 0x3d7   :  { %v1925_v57 = vpop.f32.mrf.mxu0 }
 0x3d8   :  { %v2253_v61 = vpack.c.bf16 %v1925_v57, %v1925_v57 }
 0x3d9   :  { %v3287_v62 = vpop.f32.mrf.mxu0 }
 0x3da   :  { %3334 = vmatmul.mubr.msk.bf16.vlgmr.msra.gmra.mxu0 %vm1418_vm2, %v2253_v61 }
 0x3db   :  { %v1928_v63 = vpop.f32.mrf.mxu0  ;;  %v1971_v0 = vpop.f32.mrf.mxu1  ;;  %3344 = vmatpush3.bf16.msra.mxu0 %v3434_v59  ;;  %3345 = vmatprep.mubr.msk.bf16.mxu0 %vm3491_vm0, %v3490_v1 }
 0x3dc   :  { %v2254_v3 = vpack.c.bf16 %v1971_v0, %v1971_v0  ;;  %3355 = vmatprep.subr.bf16.mxu0 %v3490_v1 }
 0x3dd   :  { %v3288_v4 = vpop.f32.mrf.mxu0  ;;  %v3293_v5 = vpop.f32.mrf.mxu1 }
 0x3de   :  { %3340 = vmatmul.mubr.msk.bf16.vlgmr.msra.gmra.mxu1 %vm1418_vm2, %v2254_v3 }
 0x3df   :  { %v1974_v6 = vpop.f32.mrf.mxu1  ;;  %3350 = vmatpush3.bf16.msra.mxu1 %v3435_v2  ;;  %3351 = vmatprep.mubr.msk.bf16.mxu1 %vm3491_vm0, %v3490_v1 }
 0x3e0   :  { %3361 = vmatprep.subr.bf16.mxu1 %v3490_v1 }
 0x3e1   :  { %v3294_v7 = vpop.f32.mrf.mxu1 }
 0x3e7   :  { %v2017_v8 = vpop.f32.mrf.mxu0 }
 0x3e8   :  { %v2255_v10 = vpack.c.bf16 %v2017_v8, %v2017_v8 }
 0x3e9   :  { %v3299_v9 = vpop.f32.mrf.mxu0 }
 0x3ea   :  { %3346 = vmatmul.mubr.msk.bf16.vlgmr.msra.gmra.mxu0 %vm1418_vm2, %v2255_v10 }
 0x3eb   :  { %v2020_v11 = vpop.f32.mrf.mxu0  ;;  %v2063_v12 = vpop.f32.mrf.mxu1  ;;  %3356 = vmatpush3.bf16.msra.mxu0 %v3432_v60  ;;  %3357 = vmatprep.mubr.msk.bf16.mxu0 %vm3491_vm0, %v3490_v1 }
 0x3ec   :  { %v2256_v13 = vpack.c.bf16 %v2063_v12, %v2063_v12  ;;  %3367 = vmatprep.subr.bf16.mxu0 %v3490_v1 }
 0x3ed   :  { %v3300_v14 = vpop.f32.mrf.mxu0  ;;  %v3305_v15 = vpop.f32.mrf.mxu1 }
 0x3ee   :  { %3352 = vmatmul.mubr.msk.bf16.vlgmr.msra.gmra.mxu1 %vm1418_vm2, %v2256_v13 }
 0x3ef   :  { %v2066_v18 = vpop.f32.mrf.mxu1  ;;  %3362 = vmatpush3.bf16.msra.mxu1 %v3433_v56  ;;  %3363 = vmatprep.mubr.msk.bf16.mxu1 %vm3491_vm0, %v3490_v1 }
 0x3f0   :  { %3373 = vmatprep.subr.bf16.mxu1 %v3490_v1 }
 0x3f1   :  { %v3306_v19 = vpop.f32.mrf.mxu1 }
 0x3f7   :  { %v2109_v20 = vpop.f32.mrf.mxu0 }
 0x3f8   :  { %v2257_v21 = vpack.c.bf16 %v2109_v20, %v2109_v20  ;;  %v2155_v22 = vpop.f32.mrf.mxu1 }
 0x3f9   :  { %v2258_v23 = vpack.c.bf16 %v2155_v22, %v2155_v22  ;;  %v3311_v16 = vpop.f32.mrf.mxu0 }
 0x3fa   :  { %v3317_v24 = vpop.f32.mrf.mxu1  ;;  %3358 = vmatmul.mubr.msk.bf16.vlgmr.msra.gmra.mxu0 %vm1418_vm2, %v2257_v21 }
 0x3fb   :  { %3364 = vmatmul.mubr.msk.bf16.vlgmr.msra.gmra.mxu1 %vm1418_vm2, %v2258_v23  ;;  %v2112_v17 = vpop.f32.mrf.mxu0  ;;  %3368 = vmatpush3.bf16.msra.mxu0 %v3434_v59 }
 0x3fc   :  { %v2158_v25 = vpop.f32.mrf.mxu1  ;;  %3374 = vmatpush3.bf16.msra.mxu1 %v3435_v2  ;;  %3369 = vmatprep.mubr.msk.bf16.mxu0 %vm3491_vm0, %v3490_v1 }
 0x3fd   :  { %v3312_v26 = vpop.f32.mrf.mxu0  ;;  %3375 = vmatprep.mubr.msk.bf16.mxu1 %vm3491_vm0, %v3490_v1 }
 0x3fe   :  { %v3318_v27 = vpop.f32.mrf.mxu1 }
 0x407   :  { %v2201_v28 = vpop.f32.mrf.mxu0 }
 0x408   :  { %v2259_v29 = vpack.c.bf16 %v2201_v28, %v2201_v28  ;;  %v2247_v30 = vpop.f32.mrf.mxu1 }
 0x409   :  { %v2260_v31 = vpack.c.bf16 %v2247_v30, %v2247_v30  ;;  %v3323_v32 = vpop.f32.mrf.mxu0 }
 0x40a   :  { %v3329_v33 = vpop.f32.mrf.mxu1  ;;  %3370 = vmatmul.mubr.msk.bf16.vlgmr.msra.gmra.mxu0 %vm1418_vm2, %v2259_v29 }
 0x40b   :  { %3376 = vmatmul.mubr.msk.bf16.vlgmr.msra.gmra.mxu1 %vm1418_vm2, %v2260_v31  ;;  %v2204_v35 = vpop.f32.mrf.mxu0 }
 0x40c   :  { %v2250_v37 = vpop.f32.mrf.mxu1 }
 0x40d   :  { %v3324_v38 = vpop.f32.mrf.mxu0 }
 0x40e   :  { %v3330_v34 = vpop.f32.mrf.mxu1 }
 0x49a   :  { %v2312_v39 = vpop.f32.mrf.mxu0 }
 0x49b   :  { %v2637_v46 = vsel %vm83_vm1, %v2312_v39, 0.0 }
 0x49c   :  { %v3335_v40 = vpop.f32.mrf.mxu0 }
 0x49e   :  { %v2315_v41 = vpop.f32.mrf.mxu0  ;;  %v2361_v42 = vpop.f32.mrf.mxu1 }
 0x49f   :  { %v2638_v45 = vsel %vm83_vm1, %v2361_v42, 0.0 }
 0x4a0   :  { %v3336_v1 = vpop.f32.mrf.mxu0  ;;  %v3341_v36 = vpop.f32.mrf.mxu1  ;;  %v2639_v50 = vadd.f32 %v2638_v45, %v2637_v46 }
 0x4a2   :  { %v2364_v43 = vpop.f32.mrf.mxu1 }
 0x4a4   :  { %v3342_v44 = vpop.f32.mrf.mxu1 }
 0x4aa   :  { %v2410_v47 = vpop.f32.mrf.mxu0 }
 0x4ab   :  { %v2640_v49 = vsel %vm83_vm1, %v2410_v47, 0.0 }
 0x4ac   :  { %v3347_v51 = vpop.f32.mrf.mxu0  ;;  %v2641_v48 = vadd.f32 %v2640_v49, %v2639_v50 }
 0x4ae   :  { %v2413_v52 = vpop.f32.mrf.mxu0  ;;  %v2459_v53 = vpop.f32.mrf.mxu1 }
 0x4af   :  { %v2642_v54 = vsel %vm83_vm1, %v2459_v53, 0.0 }
 0x4b0   :  { %v2643_v58 = vadd.f32 %v2642_v54, %v2641_v48  ;;  %v3348_v60 = vpop.f32.mrf.mxu0  ;;  %v3353_v56 = vpop.f32.mrf.mxu1 }
 0x4b2   :  { %v2658_v57 = vadd.f32 %v2778_v55, %v2643_v58  ;;  %v2462_v59 = vpop.f32.mrf.mxu1 }
 0x4b4   :  { %2660 = vst.msk [vmem:[#allocation2] sm:$0xff] %vm83_vm1, %v2658_v57  ;;  %v3354_v61 = vpop.f32.mrf.mxu1 }
 0x4ba   :  { %v2502_v62 = vpop.f32.mrf.mxu0 }
 0x4bb   :  { %v2545_v63 = vpop.f32.mrf.mxu1  ;;  %v2644_v7 = vsel %vm83_vm1, %v2502_v62, 0.0 }
 0x4bc   :  { %v3359_v0 = vpop.f32.mrf.mxu0  ;;  %v2645_v8 = vsel %vm83_vm1, %v2545_v63, 0.0 }
 0x4bd   :  { %v3365_v2 = vpop.f32.mrf.mxu1  ;;  %v2646_v10 = vadd.f32 %v2645_v8, %v2644_v7 }
 0x4be   :  { %v2505_v3 = vpop.f32.mrf.mxu0 }
 0x4bf   :  { %v2548_v4 = vpop.f32.mrf.mxu1 }
 0x4c0   :  { %v3360_v5 = vpop.f32.mrf.mxu0 }
 0x4c1   :  { %v3366_v6 = vpop.f32.mrf.mxu1 }
 0x4ca   :  { %v2588_v9 = vpop.f32.mrf.mxu0 }
 0x4cb   :  { %v2647_v11 = vsel %vm83_vm1, %v2588_v9, 0.0  ;;  %v2631_v12 = vpop.f32.mrf.mxu1 }
 0x4cc   :  { %v2648_v13 = vadd.f32 %v2647_v11, %v2646_v10  ;;  %v3371_v14 = vpop.f32.mrf.mxu0  ;;  %v2649_v15 = vsel %vm83_vm1, %v2631_v12, 0.0 }
 0x4cd   :  { %v3377_v18 = vpop.f32.mrf.mxu1 }
 0x4ce   :  { %v2650_v19 = vadd.f32 %v2649_v15, %v2648_v13  ;;  %v2591_v20 = vpop.f32.mrf.mxu0 }
 0x4cf   :  { %v2634_v21 = vpop.f32.mrf.mxu1 }
 0x4d0   :  { %v2659_v22 = vadd.f32 %v2778_v55, %v2650_v19  ;;  %v3372_v23 = vpop.f32.mrf.mxu0 }
 0x4d1   :  { %v3378_v16 = vpop.f32.mrf.mxu1 }
 0x4d2   :  { %2661 = vst.msk [vmem:[#allocation2 + $0x8] sm:$0xff] %vm83_vm1, %v2659_v22 }
 0x4d3   :  { %3479 = shalt.err (!%p3476_p4)
}
 0x4d4   :  { %s3493_s10 = smov 128   ;;  %s3494_s11 = smov 8  }
 0x4d5   :  { %2673 = dma.vmem_to_hbm [thread:$0]  %s2668_s8, 256, %s4072_s6, [#allocation3], %s3493_s10, %s3493_s10, %s3494_s11  }
 0x4d6   :  { %3488 = dma.done.wait [#allocation3], 256  }
 0x4d7   :  { %3489 = vsyncadd [#allocation3], 4294967040 }
 0x4d8   :  { %2677 = vsyncpa [#allocation3], 1 }

</bundles_post_ra>
